<compile_context>
chip_gen: v5e
topology: v5e:2x2
jax: 0.10.0
libtpu: 0.0.40
codegen_flags: <defaults>
</compile_context>

<pallas_src>
import functools
import math

import jax
import jax.numpy as jnp
from jax import lax
from jax.experimental import pallas as pl
from jax.experimental.pallas import tpu as pltpu


def _round_up(x, m):
    return ((x + m - 1) // m) * m


def _pad_axis(x, axis, target):
    pad = target - x.shape[axis]
    if pad <= 0:
        return x
    widths = [(0, 0)] * x.ndim
    widths[axis] = (0, pad)
    return jnp.pad(x, widths)


def _attention_kernel(vlen_ref, q_ref, k_ref, v_ref, o_ref,
                      m_sc, l_sc, acc_sc, *, scale, kt):
    """One (batch-tile, K-tile) step of flash-style scaled dot-product attention.

    q_ref: (Bt, Q, D)  k_ref: (Bt, Kt, D)  v_ref: (Bt, Kt, V)  o_ref: (Bt, Q, V)
    vlen_ref: (Bt, 1, 1) int32 valid lengths
    m_sc / l_sc: (Bt, Q, 1) f32 running max / denom; acc_sc: (Bt, Q, V) f32.
    """
    ki = pl.program_id(1)

    @pl.when(ki == 0)
    def _init():
        m_sc[...] = jnp.full(m_sc.shape, -jnp.inf, dtype=m_sc.dtype)
        l_sc[...] = jnp.zeros(l_sc.shape, dtype=l_sc.dtype)
        acc_sc[...] = jnp.zeros(acc_sc.shape, dtype=acc_sc.dtype)

    q = q_ref[...]
    k = k_ref[...]
    v = v_ref[...]

    # scores = q @ k^T / sqrt(d): batched contraction over D (no explicit
    # transpose, feeds the MXU directly), f32 accumulation, f32 scaling.
    s = jnp.einsum("bqd,bkd->bqk", q, k, preferred_element_type=jnp.float32)
    s = s * jnp.float32(scale)

    # masked softmax over the key axis, D2L style: invalid columns -> -1e6.
    valid = vlen_ref[...]                                          # (Bt, 1, 1)
    col = ki * kt + lax.broadcasted_iota(jnp.int32, s.shape, 2)    # (Bt, Q, Kt)
    s = jnp.where(col < valid, s, jnp.float32(-1e6))

    # online-softmax accumulation across K tiles (single pass when nk == 1).
    m_prev = m_sc[...]
    m_new = jnp.maximum(m_prev, jnp.max(s, axis=-1, keepdims=True))
    alpha = jnp.exp(m_prev - m_new)
    p = jnp.exp(s - m_new)
    l_sc[...] = alpha * l_sc[...] + jnp.sum(p, axis=-1, keepdims=True)
    # TODO(synk): nn.Dropout on the attention weights is identity in eval mode;
    # training-mode dropout (pltpu.prng_*) is not implemented here.
    acc_sc[...] = alpha * acc_sc[...] + jnp.einsum(
        "bqk,bkv->bqv", p.astype(v.dtype), v,
        preferred_element_type=jnp.float32)
    m_sc[...] = m_new

    @pl.when(ki == pl.num_programs(1) - 1)
    def _finalize():
        denom = l_sc[...]
        inv = pl.reciprocal(denom, approx=True)   # EUP slot (otherwise idle)
        inv = inv * (2.0 - denom * inv)           # one Newton step -> ~f32 exact
        o_ref[...] = (acc_sc[...] * inv).astype(o_ref.dtype)


def dot_product_attention(queries, keys, values, valid_lens=None,
                          *, block_b=None, block_kv=None):
    """queries (B,Q,D), keys (B,K,D), values (B,K,V); valid_lens: None or (B,) int.

    Equivalent to D2L DotProductAttention.forward in eval mode.
    """
    B, Q, D = queries.shape
    K = keys.shape[1]
    V = values.shape[-1]

    # TODO(synk): 2-D (per-query) valid_lens as accepted by d2l.masked_softmax
    # is not supported; only None or per-sequence (B,) lengths.
    if valid_lens is None:
        valid_lens = jnp.full((B,), K, dtype=jnp.int32)
    else:
        valid_lens = valid_lens.astype(jnp.int32)

    itemsize = jnp.dtype(queries.dtype).itemsize
    sub = {1: 32, 2: 16}.get(itemsize, 8)          # dtype-aware sublane multiple

    try:
        vmem_cap = pltpu.get_tpu_info().vmem_capacity_bytes
    except Exception:
        vmem_cap = 64 * 1024 * 1024                # v7x per-TC physical (smallest)
    budget = min(24 << 20, vmem_cap // 4)          # per-step working-set target

    def step_bytes(bt_, kt_):
        # double-buffered input/output blocks + f32 softmax scratch
        io = 2 * bt_ * (Q * D + Q * V + kt_ * (D + V)) * itemsize
        scratch = bt_ * Q * (2 + V) * 4
        return io + scratch

    # --- K tile: keep the whole key axis resident when it fits (one softmax
    # pass); otherwise flash-style K tiling with the online accumulator.
    if block_kv is not None:
        kt = max(sub, _round_up(block_kv, sub))
    else:
        kt = K
        if step_bytes(1, kt) > budget:
            kt = _round_up(2048, sub)
            while kt > sub and step_bytes(1, kt) > budget:
                kt = max(sub, _round_up(kt // 2, sub))
            nk_ = -(-K // kt)                       # rebalance to minimize padding
            kt = _round_up(-(-K // nk_), sub)
    nk = -(-K // kt)
    K_pad = nk * kt

    # --- batch tile: grow while it fits the budget; keep >= 2 grid steps along
    # the parallel batch axis so v7x's second TensorCore has work.
    if block_b is not None:
        bt = max(1, block_b)
    else:
        bt = 1
        while bt * 2 <= min(B, 16) and step_bytes(bt * 2, kt) <= budget:
            bt *= 2
        if B >= 2:
            while bt > 1 and -(-B // bt) < 2:
                bt //= 2
    B_pad = _round_up(B, bt)

    # Only grid axes are padded.  D, V, Q stay unpadded: block trailing dims
    # equal the full array dims, so no lane padding / extra HBM passes.
    q_p = _pad_axis(queries, 0, B_pad)
    k_p = _pad_axis(_pad_axis(keys, 0, B_pad), 1, K_pad)
    v_p = _pad_axis(_pad_axis(values, 0, B_pad), 1, K_pad)
    vl_p = valid_lens
    if B_pad > B:
        vl_p = jnp.pad(vl_p, (0, B_pad - B), constant_values=K)
    vl_p = vl_p.reshape(B_pad, 1, 1)

    scale = 1.0 / math.sqrt(D)
    kernel = functools.partial(_attention_kernel, scale=scale, kt=kt)

    vmem_limit = int(min(int(vmem_cap * 0.9),
                         max(32 << 20, 2 * step_bytes(bt, kt))))

    out = pl.pallas_call(
        kernel,
        out_shape=jax.ShapeDtypeStruct((B_pad, Q, V), queries.dtype),
        grid=(B_pad // bt, nk),
        in_specs=[
            pl.BlockSpec((bt, 1, 1), lambda b, k: (b, 0, 0)),     # valid_lens
            pl.BlockSpec((bt, Q, D), lambda b, k: (b, 0, 0)),     # queries
            pl.BlockSpec((bt, kt, D), lambda b, k: (b, k, 0)),    # keys
            pl.BlockSpec((bt, kt, V), lambda b, k: (b, k, 0)),    # values
        ],
        out_specs=pl.BlockSpec((bt, Q, V), lambda b, k: (b, 0, 0)),
        scratch_shapes=[
            pltpu.VMEM((bt, Q, 1), jnp.float32),   # running max
            pltpu.VMEM((bt, Q, 1), jnp.float32),   # running denom
            pltpu.VMEM((bt, Q, V), jnp.float32),   # f32 output accumulator
        ],
        compiler_params=pltpu.CompilerParams(
            dimension_semantics=("parallel", "arbitrary"),
            vmem_limit_bytes=vmem_limit,
        ),
    )(vl_p, q_p, k_p, v_p)

    if B_pad > B:
        out = out[:B]
    return out


def _reference(queries, keys, values, valid_lens):
    d = queries.shape[-1]
    scores = jnp.einsum("bqd,bkd->bqk", queries, keys) / math.sqrt(d)
    col = jnp.arange(scores.shape[-1])[None, None, :]
    mask = col < valid_lens[:, None, None]
    scores = jnp.where(mask, scores, -1e6)
    w = jax.nn.softmax(scores, axis=-1)
    return jnp.einsum("bqk,bkv->bqv", w, values)


if __name__ == "__main__":
    # Shapes implied by the D2L module's typical usage.
    B, Q, K, D, V = 2, 8, 8, 32, 32
    kq, kk, kv = jax.random.split(jax.random.PRNGKey(0), 3)
    queries = jax.random.normal(kq, (B, Q, D), dtype=jnp.float32)
    keys = jax.random.normal(kk, (B, K, D), dtype=jnp.float32)
    values = jax.random.normal(kv, (B, K, V), dtype=jnp.float32)
    valid_lens = jnp.array([3, 6], dtype=jnp.int32)

    out = dot_product_attention(queries, keys, values, valid_lens)
    jax.block_until_ready(out)
    ref = _reference(queries, keys, values, valid_lens)
    assert out.shape == (B, Q, V)
    assert jnp.allclose(out, ref, atol=1e-4, rtol=1e-4)

    # valid_lens=None path
    out2 = dot_product_attention(queries, keys, values, None)
    jax.block_until_ready(out2)
    ref2 = _reference(queries, keys, values, jnp.full((B,), K, jnp.int32))
    assert jnp.allclose(out2, ref2, atol=1e-4, rtol=1e-4)

    # Exercise the flash-style K-tiled path (nk > 1) and the batch-tiled path.
    B2, Q2, K2, D2, V2 = 8, 16, 96, 32, 48
    k1, k2, k3, k4 = jax.random.split(jax.random.PRNGKey(1), 4)
    q2 = jax.random.normal(k1, (B2, Q2, D2), dtype=jnp.float32)
    kk2 = jax.random.normal(k2, (B2, K2, D2), dtype=jnp.float32)
    vv2 = jax.random.normal(k3, (B2, K2, V2), dtype=jnp.float32)
    vl2 = jax.random.randint(k4, (B2,), 1, K2 + 1, dtype=jnp.int32)
    ref3 = _reference(q2, kk2, vv2, vl2)

    out3 = dot_product_attention(q2, kk2, vv2, vl2, block_kv=32)   # nk = 3, bt > 1
    jax.block_until_ready(out3)
    assert jnp.allclose(out3, ref3, atol=1e-4, rtol=1e-4)

    out4 = dot_product_attention(q2, kk2, vv2, vl2)                # bt > 1, nk = 1
    jax.block_until_ready(out4)
    assert jnp.allclose(out4, ref3, atol=1e-4, rtol=1e-4)

    print("KERNEL_OK")
</pallas_src>

<mosaic_0001>
module attributes {stable_mosaic.version = 11 : i64} {
  func.func @_attention_kernel(%arg0: i32, %arg1: i32, %arg2: memref<1x1x1xi32, #tpu.memory_space<vmem>>, %arg3: memref<1x8x32xf32, #tpu.memory_space<vmem>>, %arg4: memref<1x8x32xf32, #tpu.memory_space<vmem>>, %arg5: memref<1x8x32xf32, #tpu.memory_space<vmem>>, %arg6: memref<1x8x32xf32, #tpu.memory_space<vmem>>, %arg7: memref<1x8x1xf32, #tpu.memory_space<vmem>>, %arg8: memref<1x8x1xf32, #tpu.memory_space<vmem>>, %arg9: memref<1x8x32xf32, #tpu.memory_space<vmem>>) attributes {dimension_semantics = [#tpu.dimension_semantics<parallel>, #tpu.dimension_semantics<arbitrary>], iteration_bounds = array<i64: 2, 1>, scalar_prefetch = 0 : i64, scratch_operands = 3 : i64, tpu.core_type = #tpu.core_type<tc>, window_params = [{transform_indices = @transform_0, window_bounds = array<i64: 1, 1, 1>}, {transform_indices = @transform_1, window_bounds = array<i64: 1, 8, 32>}, {transform_indices = @transform_2, window_bounds = array<i64: 1, 8, 32>}, {transform_indices = @transform_3, window_bounds = array<i64: 1, 8, 32>}, {transform_indices = @transform_4, window_bounds = array<i64: 1, 8, 32>}]} {
    %c0_i32 = arith.constant 0 : i32
    %0 = arith.cmpi eq, %arg1, %c0_i32 : i32
    %1 = arith.extui %0 : i1 to i32
    %c0_i32_0 = arith.constant 0 : i32
    %2 = arith.cmpi ne, %1, %c0_i32_0 : i32
    scf.if %2 {
      %cst_37 = arith.constant 0xFF800000 : f32
      %43 = vector.broadcast %cst_37 : f32 to vector<1x8x1xf32>
      %c0_38 = arith.constant 0 : index
      %c0_39 = arith.constant 0 : index
      %c0_40 = arith.constant 0 : index
      %44 = vector.load %arg7[%c0_38, %c0_39, %c0_40] : memref<1x8x1xf32, #tpu.memory_space<vmem>>, vector<1x8x1xf32>
      tpu.vector_store %arg7[%c0_38, %c0_39, %c0_40], %43 {strides = array<i32>} : memref<1x8x1xf32, #tpu.memory_space<vmem>>, vector<1x8x1xf32>,
      %cst_41 = arith.constant 0.000000e+00 : f32
      %45 = vector.broadcast %cst_41 : f32 to vector<1x8x1xf32>
      %c0_42 = arith.constant 0 : index
      %c0_43 = arith.constant 0 : index
      %c0_44 = arith.constant 0 : index
      %46 = vector.load %arg8[%c0_42, %c0_43, %c0_44] : memref<1x8x1xf32, #tpu.memory_space<vmem>>, vector<1x8x1xf32>
      tpu.vector_store %arg8[%c0_42, %c0_43, %c0_44], %45 {strides = array<i32>} : memref<1x8x1xf32, #tpu.memory_space<vmem>>, vector<1x8x1xf32>,
      %cst_45 = arith.constant 0.000000e+00 : f32
      %47 = vector.broadcast %cst_45 : f32 to vector<1x8x32xf32>
      %c0_46 = arith.constant 0 : index
      %c0_47 = arith.constant 0 : index
      %c0_48 = arith.constant 0 : index
      %48 = vector.load %arg9[%c0_46, %c0_47, %c0_48] : memref<1x8x32xf32, #tpu.memory_space<vmem>>, vector<1x8x32xf32>
      tpu.vector_store %arg9[%c0_46, %c0_47, %c0_48], %47 {strides = array<i32>} : memref<1x8x32xf32, #tpu.memory_space<vmem>>, vector<1x8x32xf32>,
    } else {
    }
    %c0 = arith.constant 0 : index
    %c0_1 = arith.constant 0 : index
    %c0_2 = arith.constant 0 : index
    %3 = vector.load %arg3[%c0, %c0_1, %c0_2] : memref<1x8x32xf32, #tpu.memory_space<vmem>>, vector<1x8x32xf32>
    %c0_3 = arith.constant 0 : index
    %c0_4 = arith.constant 0 : index
    %c0_5 = arith.constant 0 : index
    %4 = vector.load %arg4[%c0_3, %c0_4, %c0_5] : memref<1x8x32xf32, #tpu.memory_space<vmem>>, vector<1x8x32xf32>
    %c0_6 = arith.constant 0 : index
    %c0_7 = arith.constant 0 : index
    %c0_8 = arith.constant 0 : index
    %5 = vector.load %arg5[%c0_6, %c0_7, %c0_8] : memref<1x8x32xf32, #tpu.memory_space<vmem>>, vector<1x8x32xf32>
    "tpu.trace_start"() <{level = 10 : i32, message = "bqd,bkd->bqk"}> : () -> ()
    %cst = arith.constant dense<0.000000e+00> : vector<1x8x8xf32>
    %6 = tpu.matmul %3, %4, %cst {dimension_numbers = #tpu.dot_dimension_numbers<[2], [2], [1], [1], [0, 0, 0, 1, 1, 1], [0], [0]>} : vector<1x8x32xf32>, vector<1x8x32xf32>, vector<1x8x8xf32> -> vector<1x8x8xf32>
    "tpu.trace_stop"() : () -> ()
    %cst_9 = arith.constant 0.176776692 : f32
    %7 = vector.broadcast %cst_9 : f32 to vector<1x8x8xf32>
    %8 = arith.mulf %6, %7 : vector<1x8x8xf32>
    %c0_10 = arith.constant 0 : index
    %c0_11 = arith.constant 0 : index
    %c0_12 = arith.constant 0 : index
    %9 = vector.load %arg2[%c0_10, %c0_11, %c0_12] : memref<1x1x1xi32, #tpu.memory_space<vmem>>, vector<1x1x1xi32>
    %c8_i32 = arith.constant 8 : i32
    %10 = arith.muli %arg1, %c8_i32 : i32
    %11 = tpu.iota {dimensions = array<i32: 2>} : vector<1x8x8xi32>
    %12 = vector.broadcast %10 : i32 to vector<1x8x8xi32>
    %13 = arith.addi %12, %11 : vector<1x8x8xi32>
    %14 = vector.broadcast %9 : vector<1x1x1xi32> to vector<1x8x8xi32>
    %15 = arith.cmpi slt, %13, %14 : vector<1x8x8xi32>
    %cst_13 = arith.constant -1.000000e+06 : f32
    %16 = vector.broadcast %cst_13 : f32 to vector<1x8x8xf32>
    %17 = arith.select %15, %8, %16 : vector<1x8x8xi1>, vector<1x8x8xf32>
    %c0_14 = arith.constant 0 : index
    %c0_15 = arith.constant 0 : index
    %c0_16 = arith.constant 0 : index
    %18 = vector.load %arg7[%c0_14, %c0_15, %c0_16] : memref<1x8x1xf32, #tpu.memory_space<vmem>>, vector<1x8x1xf32>
    %cst_17 = arith.constant dense<0xFF800000> : vector<1x8xf32>
    %19 = vector.multi_reduction <maximumf>, %17, %cst_17 [2] : vector<1x8x8xf32> to vector<1x8xf32>
    %20 = vector.shape_cast %19 : vector<1x8xf32> to vector<1x8x1xf32>
    %21 = arith.maximumf %18, %20 : vector<1x8x1xf32>
    %22 = arith.subf %18, %21 : vector<1x8x1xf32>
    %23 = math.exp %22 : vector<1x8x1xf32>
    %24 = vector.broadcast %21 : vector<1x8x1xf32> to vector<1x8x8xf32>
    %25 = arith.subf %17, %24 : vector<1x8x8xf32>
    %26 = math.exp %25 : vector<1x8x8xf32>
    %c0_18 = arith.constant 0 : index
    %c0_19 = arith.constant 0 : index
    %c0_20 = arith.constant 0 : index
    %27 = vector.load %arg8[%c0_18, %c0_19, %c0_20] : memref<1x8x1xf32, #tpu.memory_space<vmem>>, vector<1x8x1xf32>
    %28 = arith.mulf %23, %27 : vector<1x8x1xf32>
    %cst_21 = arith.constant dense<0.000000e+00> : vector<1x8xf32>
    %29 = vector.multi_reduction <add>, %26, %cst_21 [2] : vector<1x8x8xf32> to vector<1x8xf32>
    %30 = vector.shape_cast %29 : vector<1x8xf32> to vector<1x8x1xf32>
    %31 = arith.addf %28, %30 : vector<1x8x1xf32>
    %c0_22 = arith.constant 0 : index
    %c0_23 = arith.constant 0 : index
    %c0_24 = arith.constant 0 : index
    %32 = vector.load %arg8[%c0_22, %c0_23, %c0_24] : memref<1x8x1xf32, #tpu.memory_space<vmem>>, vector<1x8x1xf32>
    tpu.vector_store %arg8[%c0_22, %c0_23, %c0_24], %31 {strides = array<i32>} : memref<1x8x1xf32, #tpu.memory_space<vmem>>, vector<1x8x1xf32>,
    %c0_25 = arith.constant 0 : index
    %c0_26 = arith.constant 0 : index
    %c0_27 = arith.constant 0 : index
    %33 = vector.load %arg9[%c0_25, %c0_26, %c0_27] : memref<1x8x32xf32, #tpu.memory_space<vmem>>, vector<1x8x32xf32>
    %34 = vector.broadcast %23 : vector<1x8x1xf32> to vector<1x8x32xf32>
    %35 = arith.mulf %34, %33 : vector<1x8x32xf32>
    "tpu.trace_start"() <{level = 10 : i32, message = "bqk,bkv->bqv"}> : () -> ()
    %cst_28 = arith.constant dense<0.000000e+00> : vector<1x8x32xf32>
    %36 = tpu.matmul %26, %5, %cst_28 {dimension_numbers = #tpu.dot_dimension_numbers<[2], [1], [1], [2], [0, 0, 0, 1, 1, 2], [0], [0]>} : vector<1x8x8xf32>, vector<1x8x32xf32>, vector<1x8x32xf32> -> vector<1x8x32xf32>
    "tpu.trace_stop"() : () -> ()
    %37 = arith.addf %35, %36 : vector<1x8x32xf32>
    %c0_29 = arith.constant 0 : index
    %c0_30 = arith.constant 0 : index
    %c0_31 = arith.constant 0 : index
    %38 = vector.load %arg9[%c0_29, %c0_30, %c0_31] : memref<1x8x32xf32, #tpu.memory_space<vmem>>, vector<1x8x32xf32>
    tpu.vector_store %arg9[%c0_29, %c0_30, %c0_31], %37 {strides = array<i32>} : memref<1x8x32xf32, #tpu.memory_space<vmem>>, vector<1x8x32xf32>,
    %c0_32 = arith.constant 0 : index
    %c0_33 = arith.constant 0 : index
    %c0_34 = arith.constant 0 : index
    %39 = vector.load %arg7[%c0_32, %c0_33, %c0_34] : memref<1x8x1xf32, #tpu.memory_space<vmem>>, vector<1x8x1xf32>
    tpu.vector_store %arg7[%c0_32, %c0_33, %c0_34], %21 {strides = array<i32>} : memref<1x8x1xf32, #tpu.memory_space<vmem>>, vector<1x8x1xf32>,
    %c0_i32_35 = arith.constant 0 : i32
    %40 = arith.cmpi eq, %arg1, %c0_i32_35 : i32
    %41 = arith.extui %40 : i1 to i32
    %c0_i32_36 = arith.constant 0 : i32
    %42 = arith.cmpi ne, %41, %c0_i32_36 : i32
    scf.if %42 {
      %c0_37 = arith.constant 0 : index
      %c0_38 = arith.constant 0 : index
      %c0_39 = arith.constant 0 : index
      %43 = vector.load %arg8[%c0_37, %c0_38, %c0_39] : memref<1x8x1xf32, #tpu.memory_space<vmem>>, vector<1x8x1xf32>
      %44 = tpu.reciprocal %43 {approx = true} : vector<1x8x1xf32> -> vector<1x8x1xf32>
      %45 = arith.mulf %43, %44 : vector<1x8x1xf32>
      %cst_40 = arith.constant 2.000000e+00 : f32
      %46 = vector.broadcast %cst_40 : f32 to vector<1x8x1xf32>
      %47 = arith.subf %46, %45 : vector<1x8x1xf32>
      %48 = arith.mulf %44, %47 : vector<1x8x1xf32>
      %c0_41 = arith.constant 0 : index
      %c0_42 = arith.constant 0 : index
      %c0_43 = arith.constant 0 : index
      %49 = vector.load %arg9[%c0_41, %c0_42, %c0_43] : memref<1x8x32xf32, #tpu.memory_space<vmem>>, vector<1x8x32xf32>
      %50 = vector.broadcast %48 : vector<1x8x1xf32> to vector<1x8x32xf32>
      %51 = arith.mulf %49, %50 : vector<1x8x32xf32>
      %c0_44 = arith.constant 0 : index
      %c0_45 = arith.constant 0 : index
      %c0_46 = arith.constant 0 : index
      %52 = vector.load %arg6[%c0_44, %c0_45, %c0_46] : memref<1x8x32xf32, #tpu.memory_space<vmem>>, vector<1x8x32xf32>
      tpu.vector_store %arg6[%c0_44, %c0_45, %c0_46], %51 {strides = array<i32>} : memref<1x8x32xf32, #tpu.memory_space<vmem>>, vector<1x8x32xf32>,
    } else {
    }
    return
  }
  func.func @transform_0(%arg0: i32, %arg1: i32) -> (i32, i32, i32) {
    %c0_i32 = arith.constant 0 : i32
    %c0_i32_0 = arith.constant 0 : i32
    %c0_i32_1 = arith.constant 0 : i32
    return %arg0, %c0_i32, %c0_i32_0 : i32, i32, i32
  }
  func.func @transform_1(%arg0: i32, %arg1: i32) -> (i32, i32, i32) {
    %c0_i32 = arith.constant 0 : i32
    %c0_i32_0 = arith.constant 0 : i32
    %c0_i32_1 = arith.constant 0 : i32
    return %arg0, %c0_i32, %c0_i32_0 : i32, i32, i32
  }
  func.func @transform_2(%arg0: i32, %arg1: i32) -> (i32, i32, i32) {
    %c0_i32 = arith.constant 0 : i32
    %c0_i32_0 = arith.constant 0 : i32
    return %arg0, %arg1, %c0_i32 : i32, i32, i32
  }
  func.func @transform_3(%arg0: i32, %arg1: i32) -> (i32, i32, i32) {
    %c0_i32 = arith.constant 0 : i32
    %c0_i32_0 = arith.constant 0 : i32
    return %arg0, %arg1, %c0_i32 : i32, i32, i32
  }
  func.func @transform_4(%arg0: i32, %arg1: i32) -> (i32, i32, i32) {
    %c0_i32 = arith.constant 0 : i32
    %c0_i32_0 = arith.constant 0 : i32
    %c0_i32_1 = arith.constant 0 : i32
    return %arg0, %c0_i32, %c0_i32_0 : i32, i32, i32
  }
}

</mosaic_0001>

<bundles_post_ra>
// kernel: tpu_custom_call.1
= control target key start
LH: loop header
LB: loop body
LE: loop exit
PB: predicated region body
PF: predicated region fallthrough
CT: control target
= control target key end

     0   :  { %s1084_s0 = inlined_call_operand.vmem [shape: s32[2,1,1], index: 0, kind: input, shape index: {}]   ;;  %s1085_s1 = inlined_call_operand.hbm [shape: f32[2,8,32], index: 1, kind: input, shape index: {}]   ;;  %s1086_s2 = inlined_call_operand.hbm [shape: f32[2,8,32], index: 2, kind: input, shape index: {}]   ;;  %s1087_s3 = inlined_call_operand.hbm [shape: f32[2,8,32], index: 3, kind: input, shape index: {}]   ;;  %s1088_s4 = inlined_call_operand.hbm [shape: f32[2,8,32], index: 4, kind: output, shape index: {}]  }
   0x1   :  { %1092 = sst [smem:[#allocation19_spill]] %s1086_s2 }
   0x2   :  { %9 = vsyncpa [#allocation6], 0 }
   0x3   :  { %11 = vsyncpa [#allocation6 + $0x1], 0 }
   0x4   :  { %12 = vsyncpa [#allocation9], 0 }
   0x5   :  { %14 = vsyncpa [#allocation9 + $0x1], 0 }
   0x6   :  { %15 = vsyncpa [#allocation7], 0 }
   0x7   :  { %17 = vsyncpa [#allocation7 + $0x1], 0  ;;  %s909_s15 = smov 0   ;;  %s911_s16 = smov 0  }
   0x8   :  { %s913_s17 = smov 0   ;;  %s915_s18 = smov 0  }
   0x9   :  { %s917_s19 = smov 0   ;;  %s919_s20 = smov 0  }
   0xa LB: > { %1093 = sst [smem:[#allocation15_spill]] %s867_s17  ;;  %s940_s21 = sadd.s32 4294967295, %s879_s20   ;;  %s879_s20 = sphi %s919_s20, %s23_s20   ;;  %s875_s19 = sphi %s917_s19, %s1107_s19   ;;  %s871_s18 = sphi %s915_s18, %s1106_s18   ;;  %s867_s17 = sphi %s913_s17, %s1105_s17   ;;  %s863_s16 = sphi %s911_s16, %s1109_s16   ;;  %s859_s15 = sphi %s909_s15, %s1108_s15  }
   0xb   : > { %1094 = sst [smem:[#allocation16_spill]] %s875_s19  ;;  %s597_s22 = sadd.s32 4294967294, %s879_s20  }
   0xc   : > { %s35_s23 = sadd.s32 1, %s875_s19  ;;  %s68_s24 = sadd.s32 1, %s867_s17 }
   0xd   : > { %p37_p0 = scmp.ge.s32.totalorder %s35_s23, 2  ;;  %p75_p1 = scmp.ne.s32.totalorder %s867_s17, %s863_s16 }
   0xe   : > { %p76_p2 = scmp.eq.s32.totalorder %s879_s20, 0  ;;  %p81_p3 = scmp.ne.s32.totalorder %s863_s16, %s859_s15 }
   0xf   : > { %s1111_s23 = smov (%p37_p0, %s35_s23), 0  ;;  %p82_p5 = scmp.eq.s32.totalorder %s940_s21, 0 }
  0x10   : > { %1095 = sst [smem:[#allocation17_spill]] %s1111_s23  ;;  %p952_p4 = por %p76_p2, %p75_p1 }
  0x11   : > { %s65_s26 = ssub.s32 %s875_s19, %s1111_s23  ;;  %p161_p6 = scmp.eq.s32.totalorder %s940_s21, 1 }
  0x12   : > { %p66_p7 = scmp.eq.s32.totalorder %s65_s26, 0  ;;  %p960_p8 = por %p82_p5, %p81_p3 }
  0x13   : > { %p964_p9 = por %p161_p6, %p75_p1  ;;  %p167_p10 = scmp.eq.s32.totalorder %s597_s22, 1 }
  0x14   : > { %s969_s29 = scalar_select %p66_p7, %s867_s17, %s68_s24  }
  0x15   : > { %p971_p11 = por %p167_p10, %p81_p3  ;;  %p599_p12 = scmp.ge.s32.totalorder %s879_s20, 2 }
  0x16   : > { %1099 = sst [smem:[#allocation18_spill]] %s969_s29  ;;  %p640_p13 = scmp.lt.s32.totalorder %s879_s20, 2 }
  0x17   : > { %s193_s5 = sand.u32 1, %s867_s17   ;;  %s601_s7 = sshll.u32 %s875_s19, 3 }
  0x18   : > { %s600_s6 = sshll.u32 %s193_s5, 3  ;;  %p981_p0 = pnand %p640_p13, %p952_p4 }
  0x19   : > { %s212_s9 = sand.u32 1, %s879_s20   ;;  %s1102_s2 = sld [smem:[#allocation19_spill]] }
  0x1a   : > { %s216_s14 = scalar_lea.vmem [#allocation8], %s600_s6  ;;  %s213_s24 = scalar_lea.sflag [#allocation9], %s212_s9 }
  0x1b   : > { %s225_s22 = sshll.u32 %s216_s14, 4  ;;  %p606_p1 = scmp.ge.s32.totalorder %s879_s20, 1  ;;  %s226_s22 = int_to_ptr.vmem [resolvable:$true] %s225_s22 }
  0x1c   : > { %p250_p2 = scmp.lt.s32.totalorder %s879_s20, 3  ;;  %s201_s10 = scalar_lea.hbm %s1085_s1, %s601_s7 }
  0x1d   : > { %s203_s11 = sshll.u32 %s201_s10, 4  ;;  %s194_s14 = scalar_lea.sflag [#allocation6], %s193_s5  ;;  %s204_s11 = int_to_ptr.hbm [resolvable:$true] %s203_s11 }
  0x1e   : > { %p993_p3 = pnand %p606_p1, %p250_p2  ;;  %s236_s29 = scalar_lea.vmem [#allocation10], %s600_s6 }
  0x1f   : > { %s221_s12 = scalar_lea.hbm %s1102_s2, %s601_s7  ;;  %s245_s17 = sshll.u32 %s236_s29, 4  ;;  %s246_s17 = int_to_ptr.vmem [resolvable:$true] %s245_s17 }
  0x20   : > { %s223_s13 = sshll.u32 %s221_s12, 4  ;;  %s197_s12 = scalar_lea.vmem [#allocation5], %s600_s6  ;;  %s224_s13 = int_to_ptr.hbm [resolvable:$true] %s223_s13 }
  0x21   : > { %632 = dma.hbm_to_vmem [thread:$0]  (!%p981_p0), %s224_s13, 128, %s226_s22, %s213_s24  }
  0x22   : > { %s205_s2 = sshll.u32 %s197_s12, 4  ;;  %s241_s22 = scalar_lea.hbm %s1087_s3, %s601_s7  ;;  %s206_s2 = int_to_ptr.vmem [resolvable:$true] %s205_s2 }
  0x23   : > { %629 = dma.hbm_to_vmem [thread:$0]  (!%p981_p0), %s204_s11, 128, %s206_s2, %s194_s14  }
  0x24   : > { %s243_s19 = sshll.u32 %s241_s22, 4  ;;  %254 = sbr.rel (%p993_p3) target bundleno = 660 (0x294), region = 36  ;;  %s244_s19 = int_to_ptr.hbm [resolvable:$true] %s243_s19 }
  0x25   : > { %635 = dma.hbm_to_vmem [thread:$0]  (!%p981_p0), %s244_s19, 128, %s246_s17, %s213_s24  }
  0x26   : > { %s1010_s23 = sand.u32 (!%p993_p3), 1, %s863_s16  }
  0x27   : > { %s1013_s2 = sshll.u32 (!%p993_p3), %s1010_s23, 3  ;;  %s257_s5 = scalar_lea.sflag (!%p993_p3), [#allocation6], %s1010_s23 }
  0x28   : > { %s260_s7 = scalar_lea.vmem (!%p993_p3), [#allocation5], %s1013_s2 }
  0x29   : > { %846 = dma.done.wait (%p960_p8), %s257_s5, 128  }
  0x2a   : > { %848 = vsyncadd (%p960_p8), %s257_s5, 4294967168  ;;  %s266_s17 = sand.u32 1, %s940_s21   ;;  %s270_s29 = scalar_lea.vmem [#allocation8], %s1013_s2 }
  0x2b   : > { %s267_s19 = scalar_lea.sflag [#allocation9], %s266_s17 }
  0x2c   : > { %850 = dma.done.wait (%p960_p8), %s267_s19, 256  }
  0x2d   : > { %852 = vsyncadd (%p960_p8), %s267_s19, 4294967040  ;;  %vm329_vm0 = vcmask 261120   ;;  %p319_p4 = scmp.lt.s32.totalorder %s871_s18, 1  ;;  %v881_v0 = vmov 0.0   ;;  %v882_v1 = vmov 0   ;;  %v332_v2 = vld [vmem:[%s270_s29] sm:$0xff]  ;;  %v364_v6 = vlaneseq }
  0x2e   : > { %330 = vst.msk [vmem:[#allocation4] sm:$0xff] %vm329_vm0, %v881_v0  ;;  %693 = vset.pattern.permute.xlu0 %v882_v1  ;;  %694 = vset.pattern.permute.xlu1 %v882_v1  ;;  %v331_v3 = vld [vmem:[%s260_s7] sm:$0xff]  ;;  %vm326_vm1 = vcmask 7168   ;;  %v883_v5 = vmov -inf   ;;  %vm375_vm3 = vcmask 64512   ;;  %s280_s27 = scalar_lea.vmem [#allocation10], %s1013_s2 }
  0x2f   : > { %s320_s6 = scalar_select %p319_p4, %s871_s18, 1  ;;  %695 = vset.pattern.permute.xlu2 %v882_v1  ;;  %611 = vmatpush.xpose.msk.msra.mxu0 %vm329_vm0, %v332_v2  ;;  %327 = vst.msk [vmem:[#allocation2] sm:$0xff] %vm326_vm1, %v883_v5  ;;  %v365_v7 = vand.u32 127, %v364_v6  ;;  %v333_v19 = vld [vmem:[%s280_s27] sm:$0xff] }
  0x30   : > { %328 = vst.msk [vmem:[#allocation3] sm:$0xff] %vm326_vm1, %v881_v0  ;;  %424 = vmatpush.msra.mxu1 %v333_v19  ;;  %s615_s25 = sshll.u32 %s871_s18, 3  ;;  %s318_s12 = scalar_lea.vmem [#allocation11], %s1013_s2 }
  0x31   : > { %s321_s24 = scalar_lea.vmem %s1084_s0, %s320_s6  ;;  %s459_s11 = scalar_lea.hbm %s1088_s4, %s615_s25 }
  0x32   : > { %v696_v4 = vld [vmem:[%s321_s24] ss:$0 sm:$0xff]  ;;  %612 = vmatmul.msk.f32.vlgmr.msra.gmra.mxu0 %vm329_vm0, %v331_v3  ;;  %s461_s14 = sshll.u32 %s318_s12, 4  ;;  %s463_s9 = sshll.u32 %s459_s11, 4  ;;  %s462_s14 = int_to_ptr.vmem [resolvable:$true] %s461_s14  ;;  %s464_s9 = int_to_ptr.hbm [resolvable:$true] %s463_s9 }
  0x33   : > { %370 = vperm.xlu0 %693, %v696_v4   ;;  %s449_s13 = scalar_lea.sflag [#allocation7], %s1010_s23  ;;  %s807_s22 = sshra.s32 %s464_s9, 4  ;;  %s808_s22 = int_to_ptr.hbm [resolvable:$true] %s807_s22 }
  0x34   : > { %s809_s5 = scalar_lea.hbm %s808_s22, 8  ;;  %s813_s2 = scalar_lea.hbm %s1088_s4, 16 }
  0x35   : > { %v399_v29 = vld [vmem:[#allocation4] sm:$0xff]  ;;  %p810_p5 = scmp.ne.s32.totalorder %s808_s22, %s809_s5  ;;  %p814_p8 = scmp.lt.s32.totalorder %s808_s22, %s1088_s4 }
  0x36   : > { %v374_v13 = vld [vmem:[#allocation2] sm:$0xff]  ;;  %p815_p10 = scmp.lt.s32.totalorder %s813_s2, %s809_s5 }
  0x37   : > { %v391_v25 = vld [vmem:[#allocation3] sm:$0xff]  ;;  %p811_p6 = pnand %p810_p5, %p964_p9 }
  0x38   : > { %p816_p13 = por %p815_p10, %p814_p8 }
  0x39   : > { %p812_p7 = pneg %p811_p6 }
  0x3b   : > { %p817_p0 = pnand %p816_p13, %p812_p7 }
  0xa5   : > { %v371_v8 = vpop.permute.xlu0 %370 }
  0xa6   : > { %vm372_vm2 = vcmp.lt.s32.totalorder %v365_v7, %v371_v8 }
  0xaf   : > { %v358_v9 = vpop.f32.mrf.mxu0 }
  0xb0   : > { %v361_v10 = vmul.f32 0.17677669, %v358_v9 }
  0xb2   : > { %v373_v11 = vsel %vm372_vm2, %v361_v10, -1000000.0 }
  0xb3   : > { %v376_v12 = vsel %vm375_vm3, %v373_v11, -inf }
  0xb4   : > { %377 = vmax.xlane.f32.xlu0 %v376_v12 }
 0x127   : > { %v378_v14 = vpop.xlane.xlu0 %377 }
 0x128   : > { %v379_v15 = vmax.f32 %v374_v13, %v378_v14 }
 0x12a   : > { %v380_v16 = vsub.f32 %v374_v13, %v379_v15  ;;  %431 = vst.msk [vmem:[#allocation2] sm:$0xff] %vm326_vm1, %v379_v15  ;;  %385 = vperm.xlu1 %694, %v379_v15  }
 0x12c   : > { %v381_v17 = vmul.f32 1.442695, %v380_v16 }
 0x12e   : > { %697 = vpow2.f32 %v381_v17 }
 0x134   : > { %v698_v18 = vpop.eup %697 }
 0x135   : > { %402 = vperm.xlu2 %695, %v698_v18   ;;  %v392_v26 = vmul.f32 %v698_v18, %v391_v25 }
 0x18f   : > { %v403_v30 = vpop.permute.xlu2 %402 }
 0x190   : > { %v405_v31 = vmul.f32 %v403_v30, %v399_v29 }
 0x19c   : > { %v386_v20 = vpop.permute.xlu1 %385 }
 0x19d   : > { %v388_v21 = vsub.f32 %v373_v11, %v386_v20 }
 0x19f   : > { %v389_v22 = vmul.f32 1.442695, %v388_v21 }
 0x1a1   : > { %699 = vpow2.f32 %v389_v22 }
 0x1a7   : > { %v700_v23 = vpop.eup %699 }
 0x1a8   : > { %613 = vmatmul.msk.f32.vlgmr.msra.gmra.mxu1 %vm375_vm3, %v700_v23  ;;  %v393_v24 = vsel %vm375_vm3, %v700_v23, 0.0 }
 0x1a9   : > { %394 = vadd.xlane.f32.xlu1 %v393_v24 }
 0x21c   : > { %v395_v27 = vpop.xlane.xlu1 %394 }
 0x21d   : > { %v396_v28 = vadd.f32 %v395_v27, %v392_v26 }
 0x21f   : > { %398 = vst.msk [vmem:[#allocation3] sm:$0xff] %vm326_vm1, %v396_v28 }
 0x225   : > { %v426_v32 = vpop.f32.mrf.mxu1 }
 0x226   : > { %v429_v33 = vadd.f32 %v426_v32, %v405_v31  ;;  %v435_v34 = vld [vmem:[#allocation3] sm:$0xff] }
 0x227   : > { %701 = vrcp.f32 %v435_v34 }
 0x228   : > { %430 = vst.msk [vmem:[#allocation4] sm:$0xff] %vm329_vm0, %v429_v33 }
 0x22d   : > { %v702_v35 = vpop.eup %701 }
 0x22e   : > { %v437_v36 = vmul.f32 %v702_v35, %v435_v34 }
 0x22f   : > { %v440_v39 = vld [vmem:[#allocation4] sm:$0xff] }
 0x230   : > { %v438_v37 = vsub.f32 2.0, %v437_v36 }
 0x232   : > { %v439_v38 = vmul.f32 %v702_v35, %v438_v37 }
 0x234   : > { %443 = vperm.xlu2 %695, %v439_v38  }
 0x28e   : > { %v444_v40 = vpop.permute.xlu2 %443 }
 0x28f   : > { %v446_v41 = vmul.f32 %v444_v40, %v440_v39 }
 0x291   : > { %447 = vst.msk [vmem:[%s318_s12] sm:$0xff] %vm329_vm0, %v446_v41 }
 0x292   : > { %820 = shalt.err (!%p817_p0)
}
 0x293   : > { %624 = dma.vmem_to_hbm [thread:$0]  (%p964_p9), %s462_s14, 128, %s464_s9, %s449_s13  }
 0x294 PF: > { %s475_s23 = sand.u32 1, %s859_s15   ;;  %p637_p1 = pnand %p599_p12, %p971_p11 }
 0x295   : > { %s476_s29 = scalar_lea.sflag [#allocation7], %s475_s23 }
 0x296   : > { %p638_p2 = pneg %p637_p1 }
 0x298   : > { %854 = dma.done.wait (%p638_p2), %s476_s29, 128  }
 0x299   : > { %856 = vsyncadd (%p638_p2), %s476_s29, 4294967168  ;;  %s23_s20 = sadd.s32 1, %s879_s20   ;;  %s1104_s6 = sld [smem:[#allocation15_spill]] }
 0x29a   : > { %p20_p3 = scmp.ge.s32.totalorder %s23_s20, 4   ;;  %s1105_s17 = sld [smem:[#allocation18_spill]] }
 0x29b   : > { %s1106_s18 = sld [smem:[#allocation16_spill]]  ;;  %s1108_s15 = smov %s863_s16 }
 0x29c   : > { %s1107_s19 = sld [smem:[#allocation17_spill]]  ;;  %22 = sbr.rel (!%p20_p3) target bundleno = 10 (0xa), region = 116 }
 0x29f   : > { %s1109_s16 = smov %s1104_s6 }
 0x2a1   :  { %482 = vsyncpa [#allocation6], 1 }
 0x2a2   :  { %484 = vsyncpa [#allocation6 + $0x1], 1 }
 0x2a3   :  { %485 = vsyncpa [#allocation9], 1 }
 0x2a4   :  { %487 = vsyncpa [#allocation9 + $0x1], 1 }
 0x2a5   :  { %488 = vsyncpa [#allocation7], 1 }
 0x2a6   :  { %490 = vsyncpa [#allocation7 + $0x1], 1 }

</bundles_post_ra>
